<compile_context>
chip_gen: v7x
topology: tpu7x:2x2x1
jax: 0.10.0
libtpu: 0.0.40
codegen_flags: <defaults>
</compile_context>

<pallas_src>
import functools

import jax
import jax.numpy as jnp
from jax.experimental import pallas as pl
from jax.experimental.pallas import tpu as pltpu

_LANE = 128
_SUBLANE = 8


def _masked_mse_kernel(pred_ref, gt_ref, sum_ref, cnt_ref, *,
                       block_rows, rows, steps_per_slice, needs_row_mask):
    p = pl.program_id(0)   # parallel slice (megacore-friendly)
    j = pl.program_id(1)   # sequential reduction steps within the slice

    @pl.when(j == 0)
    def _():
        sum_ref[...] = jnp.zeros_like(sum_ref)
        cnt_ref[...] = jnp.zeros_like(cnt_ref)

    # In-kernel upcast keeps HBM traffic at the native dtype width.
    pred = pred_ref[...].astype(jnp.float32)
    gt = gt_ref[...].astype(jnp.float32)

    valid = gt > -100.0
    if needs_row_mask:
        # Global row index of each element in this tile, computed from the
        # *unclamped* step index so over-run / partial tiles contribute nothing
        # (their index_map is clamped to a valid tile, this mask zeroes them).
        row_base = (p * steps_per_slice + j) * block_rows
        row_idx = (jax.lax.broadcasted_iota(jnp.int32, (block_rows, _LANE), 0)
                   + row_base)
        valid = valid & (row_idx < rows)

    err = pred - gt
    sq = jnp.where(valid, err * err, 0.0)
    cnt = valid.astype(jnp.float32)

    # Per-(sublane, lane) partial sums: reducing over the leading axis of a
    # (block_rows//8, 8, 128) view is just elementwise vreg adds on the VPU.
    sum_ref[...] += sq.reshape(block_rows // _SUBLANE, _SUBLANE, _LANE).sum(axis=0)
    cnt_ref[...] += cnt.reshape(block_rows // _SUBLANE, _SUBLANE, _LANE).sum(axis=0)


def h_mse_loss(prediction, gt, *, block_rows_max=4096, num_slices=2):
    """Masked MSE loss matching H_MSELoss.forward semantics."""
    pred_f = prediction.reshape(-1)
    gt_f = gt.reshape(-1)
    n = pred_f.shape[0]

    # Only pad the tail to a multiple of the lane width when needed (rare for
    # NCHW tensors). Padded gt = -1000 (< -100) so padding is masked out.
    rem = n % _LANE
    if rem:
        pad = _LANE - rem
        pred_f = jnp.pad(pred_f, (0, pad))
        gt_f = jnp.pad(gt_f, (0, pad), constant_values=-1000.0)

    rows = pred_f.shape[0] // _LANE
    pred2 = pred_f.reshape(rows, _LANE)
    gt2 = gt_f.reshape(rows, _LANE)

    # Tile sizing: multiple of 8 sublanes, capped at block_rows_max
    # (4096 rows * 128 lanes * 4 B = 2 MiB per f32 input tile).
    block_rows = min(block_rows_max, max(_SUBLANE, pl.cdiv(rows, _SUBLANE) * _SUBLANE))
    total_steps = pl.cdiv(rows, block_rows)
    num_slices = max(1, min(num_slices, total_steps))
    steps_per_slice = pl.cdiv(total_steps, num_slices)

    # Row masking is only needed when the grid does not tile the input exactly.
    needs_row_mask = (rows % block_rows != 0) or (
        steps_per_slice * num_slices != total_steps)

    def in_map(p, j):
        # Clamp so the few over-run steps of a ragged slice re-read a valid
        # tile; the in-kernel row mask zeroes their contribution.
        return (jnp.minimum(p * steps_per_slice + j, total_steps - 1), 0)

    kernel = functools.partial(
        _masked_mse_kernel,
        block_rows=block_rows,
        rows=rows,
        steps_per_slice=steps_per_slice,
        needs_row_mask=needs_row_mask,
    )

    sums, cnts = pl.pallas_call(
        kernel,
        out_shape=(
            jax.ShapeDtypeStruct((num_slices, _SUBLANE, _LANE), jnp.float32),
            jax.ShapeDtypeStruct((num_slices, _SUBLANE, _LANE), jnp.float32),
        ),
        grid_spec=pltpu.PrefetchScalarGridSpec(
            num_scalar_prefetch=0,
            grid=(num_slices, steps_per_slice),
            in_specs=[
                pl.BlockSpec((block_rows, _LANE), in_map),
                pl.BlockSpec((block_rows, _LANE), in_map),
            ],
            out_specs=[
                pl.BlockSpec((None, _SUBLANE, _LANE), lambda p, j: (p, 0, 0)),
                pl.BlockSpec((None, _SUBLANE, _LANE), lambda p, j: (p, 0, 0)),
            ],
        ),
        compiler_params=pltpu.CompilerParams(
            dimension_semantics=("parallel", "arbitrary"),
            vmem_limit_bytes=32 << 20,
        ),
    )(pred2, gt2)

    # Final cross-slice / cross-lane reduce + divide (tiny, done once).
    # Note: if no element is valid this yields NaN, matching torch.mean of an
    # empty selection.
    return jnp.sum(sums) / jnp.sum(cnts)


def h_mse_loss_ref(prediction, gt):
    pred_f = prediction.astype(jnp.float32)
    gt_f = gt.astype(jnp.float32)
    err = pred_f - gt_f
    mask = gt_f > -100.0
    sq = jnp.where(mask, err * err, 0.0)
    return jnp.sum(sq) / jnp.sum(mask.astype(jnp.float32))


def _make_inputs(key, shape):
    k1, k2, k3 = jax.random.split(key, 3)
    prediction = jax.random.normal(k1, shape, dtype=jnp.float32)
    gt = jax.random.normal(k2, shape, dtype=jnp.float32)
    invalid = jax.random.uniform(k3, shape) < 0.25
    gt = jnp.where(invalid, -1000.0, gt)
    return prediction, gt


if __name__ == "__main__":
    key = jax.random.PRNGKey(0)

    # Primary test: NCHW like the PyTorch inputs (exactly tiled -> no row mask).
    prediction, gt = _make_inputs(key, (2, 4, 16, 16))
    loss = jax.block_until_ready(h_mse_loss(prediction, gt))
    ref = jax.block_until_ready(h_mse_loss_ref(prediction, gt))
    assert jnp.allclose(loss, ref, rtol=1e-5, atol=1e-6), (loss, ref)

    # Non-lane-aligned shape: exercises tail padding + partial-tile row mask.
    p2, g2 = _make_inputs(jax.random.PRNGKey(1), (2, 3, 11, 13))
    l2 = jax.block_until_ready(h_mse_loss(p2, g2))
    r2 = jax.block_until_ready(h_mse_loss_ref(p2, g2))
    assert jnp.allclose(l2, r2, rtol=1e-5, atol=1e-6), (l2, r2)

    # Multi-step + 2 parallel slices with a ragged step count (small tiles
    # forced via block_rows_max just to exercise the accumulation / mask path).
    p3, g3 = _make_inputs(jax.random.PRNGKey(2), (7, 4, 16, 16))
    l3 = jax.block_until_ready(h_mse_loss(p3, g3, block_rows_max=8))
    r3 = jax.block_until_ready(h_mse_loss_ref(p3, g3))
    assert jnp.allclose(l3, r3, rtol=1e-5, atol=1e-6), (l3, r3)

    # Exactly-tiled multi-step path (mask compiled out, multiple slices).
    p4, g4 = _make_inputs(jax.random.PRNGKey(3), (8, 4, 16, 16))
    l4 = jax.block_until_ready(h_mse_loss(p4, g4, block_rows_max=32))
    r4 = jax.block_until_ready(h_mse_loss_ref(p4, g4))
    assert jnp.allclose(l4, r4, rtol=1e-5, atol=1e-6), (l4, r4)

    print("KERNEL_OK")
</pallas_src>

<mosaic_0001>
module attributes {stable_mosaic.version = 11 : i64} {
  func.func @_masked_mse_kernel(%arg0: i32, %arg1: i32, %arg2: memref<16x128xf32, #tpu.memory_space<vmem>>, %arg3: memref<16x128xf32, #tpu.memory_space<vmem>>, %arg4: memref<1x8x128xf32, #tpu.memory_space<vmem>>, %arg5: memref<1x8x128xf32, #tpu.memory_space<vmem>>) attributes {dimension_semantics = [#tpu.dimension_semantics<parallel>, #tpu.dimension_semantics<arbitrary>], iteration_bounds = array<i64: 1, 1>, scalar_prefetch = 0 : i64, scratch_operands = 0 : i64, tpu.core_type = #tpu.core_type<tc>, window_params = [{transform_indices = @transform_0, window_bounds = array<i64: 16, 128>}, {transform_indices = @transform_1, window_bounds = array<i64: 16, 128>}, {transform_indices = @transform_2, window_bounds = array<i64: 1, 8, 128>}, {transform_indices = @transform_3, window_bounds = array<i64: 1, 8, 128>}]} {
    %c0_i32 = arith.constant 0 : i32
    %0 = arith.cmpi eq, %arg1, %c0_i32 : i32
    %1 = arith.extui %0 : i1 to i32
    %c0_i32_0 = arith.constant 0 : i32
    %2 = arith.cmpi ne, %1, %c0_i32_0 : i32
    scf.if %2 {
      %cst_19 = arith.constant 0.000000e+00 : f32
      %29 = vector.broadcast %cst_19 : f32 to vector<8x128xf32>
      %c0_20 = arith.constant 0 : index
      %c0_21 = arith.constant 0 : index
      %c0_22 = arith.constant 0 : index
      %30 = vector.load %arg4[%c0_20, %c0_21, %c0_22] : memref<1x8x128xf32, #tpu.memory_space<vmem>>, vector<1x8x128xf32>
      %31 = vector.shape_cast %30 : vector<1x8x128xf32> to vector<8x128xf32>
      %32 = vector.shape_cast %29 : vector<8x128xf32> to vector<1x8x128xf32>
      tpu.vector_store %arg4[%c0_20, %c0_21, %c0_22], %32 {strides = array<i32>} : memref<1x8x128xf32, #tpu.memory_space<vmem>>, vector<1x8x128xf32>,
      %cst_23 = arith.constant 0.000000e+00 : f32
      %33 = vector.broadcast %cst_23 : f32 to vector<8x128xf32>
      %c0_24 = arith.constant 0 : index
      %c0_25 = arith.constant 0 : index
      %c0_26 = arith.constant 0 : index
      %34 = vector.load %arg5[%c0_24, %c0_25, %c0_26] : memref<1x8x128xf32, #tpu.memory_space<vmem>>, vector<1x8x128xf32>
      %35 = vector.shape_cast %34 : vector<1x8x128xf32> to vector<8x128xf32>
      %36 = vector.shape_cast %33 : vector<8x128xf32> to vector<1x8x128xf32>
      tpu.vector_store %arg5[%c0_24, %c0_25, %c0_26], %36 {strides = array<i32>} : memref<1x8x128xf32, #tpu.memory_space<vmem>>, vector<1x8x128xf32>,
    } else {
    }
    %c0 = arith.constant 0 : index
    %c0_1 = arith.constant 0 : index
    %3 = vector.load %arg2[%c0, %c0_1] : memref<16x128xf32, #tpu.memory_space<vmem>>, vector<16x128xf32>
    %c0_2 = arith.constant 0 : index
    %c0_3 = arith.constant 0 : index
    %4 = vector.load %arg3[%c0_2, %c0_3] : memref<16x128xf32, #tpu.memory_space<vmem>>, vector<16x128xf32>
    %cst = arith.constant -1.000000e+02 : f32
    %5 = vector.broadcast %cst : f32 to vector<16x128xf32>
    %6 = arith.cmpf ogt, %4, %5 : vector<16x128xf32>
    %7 = arith.subf %3, %4 : vector<16x128xf32>
    %8 = arith.mulf %7, %7 : vector<16x128xf32>
    %cst_4 = arith.constant 0.000000e+00 : f32
    %9 = vector.broadcast %cst_4 : f32 to vector<16x128xf32>
    %10 = arith.select %6, %8, %9 : vector<16x128xi1>, vector<16x128xf32>
    %11 = arith.extui %6 : vector<16x128xi1> to vector<16x128xi32>
    %12 = arith.sitofp %11 : vector<16x128xi32> to vector<16x128xf32>
    %c0_5 = arith.constant 0 : index
    %c0_6 = arith.constant 0 : index
    %c0_7 = arith.constant 0 : index
    %13 = vector.load %arg4[%c0_5, %c0_6, %c0_7] : memref<1x8x128xf32, #tpu.memory_space<vmem>>, vector<1x8x128xf32>
    %14 = vector.shape_cast %13 : vector<1x8x128xf32> to vector<8x128xf32>
    %15 = vector.shape_cast %10 : vector<16x128xf32> to vector<2x8x128xf32>
    %cst_8 = arith.constant dense<0.000000e+00> : vector<8x128xf32>
    %16 = vector.multi_reduction <add>, %15, %cst_8 [0] : vector<2x8x128xf32> to vector<8x128xf32>
    %17 = arith.addf %14, %16 : vector<8x128xf32>
    %c0_9 = arith.constant 0 : index
    %c0_10 = arith.constant 0 : index
    %c0_11 = arith.constant 0 : index
    %18 = vector.load %arg4[%c0_9, %c0_10, %c0_11] : memref<1x8x128xf32, #tpu.memory_space<vmem>>, vector<1x8x128xf32>
    %19 = vector.shape_cast %18 : vector<1x8x128xf32> to vector<8x128xf32>
    %20 = vector.shape_cast %17 : vector<8x128xf32> to vector<1x8x128xf32>
    tpu.vector_store %arg4[%c0_9, %c0_10, %c0_11], %20 {strides = array<i32>} : memref<1x8x128xf32, #tpu.memory_space<vmem>>, vector<1x8x128xf32>,
    %c0_12 = arith.constant 0 : index
    %c0_13 = arith.constant 0 : index
    %c0_14 = arith.constant 0 : index
    %21 = vector.load %arg5[%c0_12, %c0_13, %c0_14] : memref<1x8x128xf32, #tpu.memory_space<vmem>>, vector<1x8x128xf32>
    %22 = vector.shape_cast %21 : vector<1x8x128xf32> to vector<8x128xf32>
    %23 = vector.shape_cast %12 : vector<16x128xf32> to vector<2x8x128xf32>
    %cst_15 = arith.constant dense<0.000000e+00> : vector<8x128xf32>
    %24 = vector.multi_reduction <add>, %23, %cst_15 [0] : vector<2x8x128xf32> to vector<8x128xf32>
    %25 = arith.addf %22, %24 : vector<8x128xf32>
    %c0_16 = arith.constant 0 : index
    %c0_17 = arith.constant 0 : index
    %c0_18 = arith.constant 0 : index
    %26 = vector.load %arg5[%c0_16, %c0_17, %c0_18] : memref<1x8x128xf32, #tpu.memory_space<vmem>>, vector<1x8x128xf32>
    %27 = vector.shape_cast %26 : vector<1x8x128xf32> to vector<8x128xf32>
    %28 = vector.shape_cast %25 : vector<8x128xf32> to vector<1x8x128xf32>
    tpu.vector_store %arg5[%c0_16, %c0_17, %c0_18], %28 {strides = array<i32>} : memref<1x8x128xf32, #tpu.memory_space<vmem>>, vector<1x8x128xf32>,
    return
  }
  func.func @transform_0(%arg0: i32, %arg1: i32) -> (i32, i32) {
    %c1_i32 = arith.constant 1 : i32
    %0 = arith.muli %arg0, %c1_i32 : i32
    %1 = arith.addi %0, %arg1 : i32
    %c0_i32 = arith.constant 0 : i32
    %2 = arith.minsi %1, %c0_i32 : i32
    %c0_i32_0 = arith.constant 0 : i32
    %c0_i32_1 = arith.constant 0 : i32
    return %2, %c0_i32_0 : i32, i32
  }
  func.func @transform_1(%arg0: i32, %arg1: i32) -> (i32, i32) {
    %c1_i32 = arith.constant 1 : i32
    %0 = arith.muli %arg0, %c1_i32 : i32
    %1 = arith.addi %0, %arg1 : i32
    %c0_i32 = arith.constant 0 : i32
    %2 = arith.minsi %1, %c0_i32 : i32
    %c0_i32_0 = arith.constant 0 : i32
    %c0_i32_1 = arith.constant 0 : i32
    return %2, %c0_i32_0 : i32, i32
  }
  func.func @transform_2(%arg0: i32, %arg1: i32) -> (i32, i32, i32) {
    %c0_i32 = arith.constant 0 : i32
    %c0_i32_0 = arith.constant 0 : i32
    %c0_i32_1 = arith.constant 0 : i32
    return %arg0, %c0_i32, %c0_i32_0 : i32, i32, i32
  }
  func.func @transform_3(%arg0: i32, %arg1: i32) -> (i32, i32, i32) {
    %c0_i32 = arith.constant 0 : i32
    %c0_i32_0 = arith.constant 0 : i32
    %c0_i32_1 = arith.constant 0 : i32
    return %arg0, %c0_i32, %c0_i32_0 : i32, i32, i32
  }
}

</mosaic_0001>

<bundles_post_ra>
// kernel: tpu_custom_call.1
= control target key start
LH: loop header
LB: loop body
LE: loop exit
PB: predicated region body
PF: predicated region fallthrough
CT: control target
= control target key end

     0   :  { %9 = vsyncpa [#allocation3], 0  ;;  %s307_s0 = inlined_call_operand.hbm [shape: f32[16,128], index: 0, kind: input, shape index: {}]   ;;  %s308_s1 = inlined_call_operand.hbm [shape: f32[16,128], index: 1, kind: input, shape index: {}]   ;;  %s309_s2 = inlined_call_operand.hbm [shape: f32[1,8,128], index: 2, kind: output, shape index: {0}]   ;;  %s310_s3 = inlined_call_operand.hbm [shape: f32[1,8,128], index: 3, kind: output, shape index: {1}]  }
   0x1   :  { %10 = vsyncpa [#allocation6], 0 }
   0x2   :  { %11 = vsyncpa [#allocation4], 0 }
   0x3   :  { %12 = vsyncpa [#allocation9], 0  ;;  %s232_s12 = smov [#allocation2]   ;;  %s136_s16 = scalar_lea.hbm %s307_s0, 256 }
   0x4   :  { %s24_s13 = sshll.u32 %s232_s12, 4  ;;  %p137_p0 = scmp.ne.s32.totalorder %s307_s0, %s136_s16  ;;  %s25_s13 = int_to_ptr.vmem [resolvable:$true] %s24_s13 }
   0x5   :  { %p140_p1 = scmp.lt.u32.totalorder %s136_s16, %s307_s0 }
   0x7   :  { %p142_p2 = pnand %p140_p1, %p137_p0 }
   0x9   :  { %145 = shalt.err (!%p142_p2)
}
   0xa   :  { %s146_s21 = scalar_lea.vmem %s25_s13, 256  ;;  %p151_p4 = scmp.lt.s32.totalorder %s25_s13, %s25_s13 }
   0xb   :  { %p147_p3 = scmp.ne.s32.totalorder %s25_s13, %s146_s21  ;;  %p152_p5 = scmp.lt.s32.totalorder %s146_s21, %s146_s21 }
   0xd   :  { %p153_p6 = por %p152_p5, %p151_p4 }
   0xf   :  { %p154_p7 = pnand %p153_p6, %p147_p3 }
  0x11   :  { %157 = shalt.err (!%p154_p7)
}
  0x12   :  { %s233_s22 = smov 128   ;;  %s234_s23 = smov 8  }
  0x13   :  { %30 = dma.hbm_to_vmem [thread:$0]  %s307_s0, 256, %s25_s13, [#allocation3], %s233_s22, %s233_s22, %s234_s23  }
  0x14   :  { %s235_s26 = smov [#allocation5]   ;;  %s158_s30 = scalar_lea.hbm %s308_s1, 256 }
  0x15   :  { %s42_s27 = sshll.u32 %s235_s26, 4  ;;  %p159_p8 = scmp.ne.s32.totalorder %s308_s1, %s158_s30  ;;  %s43_s27 = int_to_ptr.vmem [resolvable:$true] %s42_s27 }
  0x16   :  { %p162_p9 = scmp.lt.u32.totalorder %s158_s30, %s308_s1 }
  0x18   :  { %p164_p10 = pnand %p162_p9, %p159_p8 }
  0x1a   :  { %167 = shalt.err (!%p164_p10)
}
  0x1b   :  { %s168_s8 = scalar_lea.vmem %s43_s27, 256  ;;  %p173_p12 = scmp.lt.s32.totalorder %s43_s27, %s43_s27 }
  0x1c   :  { %p169_p11 = scmp.ne.s32.totalorder %s43_s27, %s168_s8  ;;  %p174_p13 = scmp.lt.s32.totalorder %s168_s8, %s168_s8 }
  0x1e   :  { %p175_p0 = por %p174_p13, %p173_p12 }
  0x20   :  { %p176_p1 = pnand %p175_p0, %p169_p11 }
  0x22   :  { %179 = shalt.err (!%p176_p1)
}
  0x23   :  { %48 = dma.hbm_to_vmem [thread:$0]  %s308_s1, 256, %s43_s27, [#allocation6], %s233_s22, %s233_s22, %s234_s23  }
  0x24   :  { %224 = dma.done.wait [#allocation3], 256  }
  0x25   :  { %225 = vsyncadd [#allocation3], 4294967040 }
  0x26   :  { %226 = dma.done.wait [#allocation6], 256  }
  0x27   :  { %227 = vsyncadd [#allocation6], 4294967040  ;;  %v69_v0 = vld [vmem:[#allocation2] sm:$0xff]  ;;  %v70_v1 = vld [vmem:[#allocation2 + $0x8] sm:$0xff]  ;;  %v236_v6 = vmov 0.0   ;;  %s237_s10 = smov [#allocation8]  }
  0x28   :  { %v71_v2 = vld [vmem:[#allocation5] sm:$0xff]  ;;  %v72_v3 = vld [vmem:[#allocation5 + $0x8] sm:$0xff]  ;;  %s109_s11 = sshll.u32 %s237_s10, 4  ;;  %s238_s1 = smov [#allocation7]   ;;  %s110_s11 = int_to_ptr.vmem [resolvable:$true] %s109_s11 }
  0x29   :  { %vm73_vm0 = vcmp.gt.f32.partialorder %v71_v2, -100.0  ;;  %v75_v4 = vsub.f32 %v69_v0, %v71_v2  ;;  %vm74_vm1 = vcmp.gt.f32.partialorder %v72_v3, -100.0  ;;  %v76_v5 = vsub.f32 %v70_v1, %v72_v3  ;;  %s99_s12 = sshll.u32 %s238_s1, 4  ;;  %s180_s13 = scalar_lea.vmem %s110_s11, 128  ;;  %s100_s12 = int_to_ptr.vmem [resolvable:$true] %s99_s12 }
  0x2a   :  { %v127_v7 = vsel %vm73_vm0, 1.0, %v236_v6  ;;  %v128_v9 = vsel %vm74_vm1, 1.0, %v236_v6  ;;  %p181_p2 = scmp.ne.s32.totalorder %s110_s11, %s180_s13  ;;  %p185_p3 = scmp.lt.s32.totalorder %s110_s11, %s110_s11 }
  0x2b   :  { %v77_v8 = vmul.f32 %v75_v4, %v75_v4  ;;  %v78_v10 = vmul.f32 %v76_v5, %v76_v5  ;;  %v90_v11 = vadd.f32 %v128_v9, %v127_v7  ;;  %p186_p4 = scmp.lt.s32.totalorder %s180_s13, %s180_s13 }
  0x2d   :  { %v79_v12 = vsel %vm73_vm0, %v77_v8, 0.0  ;;  %v80_v13 = vsel %vm74_vm1, %v78_v10, 0.0  ;;  %92 = vst [vmem:[#allocation8] sm:$0xff] %v90_v11  ;;  %p187_p5 = por %p186_p4, %p185_p3 }
  0x2e   :  { %v86_v14 = vadd.f32 %v80_v13, %v79_v12 }
  0x2f   :  { %p188_p6 = pnand %p187_p5, %p181_p2 }
  0x31   :  { %191 = shalt.err (!%p188_p6)
}
  0x32   :  { %s192_s16 = scalar_lea.hbm %s310_s3, 128 }
  0x33   :  { %p193_p7 = scmp.ne.s32.totalorder %s310_s3, %s192_s16  ;;  %p196_p8 = scmp.lt.u32.totalorder %s192_s16, %s310_s3 }
  0x35   :  { %p198_p9 = pnand %p196_p8, %p193_p7 }
  0x37   :  { %201 = shalt.err (!%p198_p9)
}
  0x38   :  { %112 = dma.vmem_to_hbm [thread:$0]  %s110_s11, 128, %s310_s3, [#allocation9]   ;;  %88 = vst [vmem:[#allocation7] sm:$0xff] %v86_v14 }
  0x39   :  { %s202_s23 = scalar_lea.vmem %s100_s12, 128  ;;  %p207_p11 = scmp.lt.s32.totalorder %s100_s12, %s100_s12 }
  0x3a   :  { %p203_p10 = scmp.ne.s32.totalorder %s100_s12, %s202_s23  ;;  %p208_p12 = scmp.lt.s32.totalorder %s202_s23, %s202_s23 }
  0x3c   :  { %p209_p13 = por %p208_p12, %p207_p11 }
  0x3e   :  { %p210_p0 = pnand %p209_p13, %p203_p10 }
  0x40   :  { %213 = shalt.err (!%p210_p0)
}
  0x41   :  { %s214_s26 = scalar_lea.hbm %s309_s2, 128 }
  0x42   :  { %p215_p1 = scmp.ne.s32.totalorder %s309_s2, %s214_s26  ;;  %p218_p2 = scmp.lt.u32.totalorder %s214_s26, %s309_s2 }
  0x44   :  { %p220_p3 = pnand %p218_p2, %p215_p1 }
  0x46   :  { %223 = shalt.err (!%p220_p3)
}
  0x47   :  { %102 = dma.vmem_to_hbm [thread:$0]  %s100_s12, 128, %s309_s2, [#allocation4]  }
  0x48   :  { %228 = dma.done.wait [#allocation4], 128  }
  0x49   :  { %229 = vsyncadd [#allocation4], 4294967168 }
  0x4a   :  { %230 = dma.done.wait [#allocation9], 128  }
  0x4b   :  { %231 = vsyncadd [#allocation9], 4294967168 }
  0x4c   :  { %119 = vsyncpa [#allocation3], 1 }
  0x4d   :  { %120 = vsyncpa [#allocation6], 1 }
  0x4e   :  { %121 = vsyncpa [#allocation4], 1 }
  0x4f   :  { %122 = vsyncpa [#allocation9], 1 }

</bundles_post_ra>
